<compile_context>
chip_gen: v5e
topology: v5e:2x2
jax: 0.10.0
libtpu: 0.0.40
codegen_flags: <defaults>
</compile_context>

<pallas_src>
from functools import partial

import jax
import jax.numpy as jnp
from jax.experimental import pallas as pl
from jax.experimental.pallas import tpu as pltpu


def _round_up(n, m):
    return ((n + m - 1) // m) * m


# --------------------------------------------------------------------------
# Fused kernel: y = relu(x @ W1); for each block: y += relu(relu(y@Wa) @ Wb)
# --------------------------------------------------------------------------
def _make_fused_kernel(num_res):
    def kernel(*refs):
        x_ref = refs[0]                      # [TB, C]
        w1_ref = refs[1]                     # [C, Mp]
        o_ref = refs[2 + 2 * num_res]        # [TB, Mp]

        y = jnp.maximum(
            jnp.dot(x_ref[...], w1_ref[...], preferred_element_type=jnp.float32),
            0.0,
        )
        for i in range(num_res):             # static unroll over residual blocks
            wa = refs[2 + 2 * i][...]        # [Mp, Mp]
            wb = refs[3 + 2 * i][...]        # [Mp, Mp]
            h = jnp.maximum(
                jnp.dot(y.astype(wa.dtype), wa, preferred_element_type=jnp.float32),
                0.0,
            )
            t = jnp.maximum(
                jnp.dot(h.astype(wb.dtype), wb, preferred_element_type=jnp.float32),
                0.0,
            )
            y = y + t
        o_ref[...] = y.astype(o_ref.dtype)

    return kernel


# --------------------------------------------------------------------------
# VMEM budget / batch-tile selection
# --------------------------------------------------------------------------
def _vmem_budget_bytes():
    """~75% of per-core VMEM (v5e/v6e 128 MiB, v7x 64 MiB per TC)."""
    try:
        cap = int(pltpu.get_tpu_info().vmem_capacity_bytes)
    except Exception:
        cap = 64 << 20                       # conservative fallback (v7x per-TC)
    return max((cap * 3) // 4, 16 << 20)


def _choose_batch_tile(batch, c, mp, dtype_bytes, num_res, budget_bytes):
    # Sublane multiple is dtype-aware (packed sublanes for sub-32-bit dtypes).
    sub = max(8, 32 // dtype_bytes)
    # Weights are VMEM-resident but Pallas still double-buffers them
    # (index_map is constant); count 2x their size against the budget.
    weight_bytes = 2 * (c * mp + 2 * num_res * mp * mp) * dtype_bytes
    avail = max(budget_bytes - weight_bytes, 2 << 20)
    # Per-row cost: double-buffered streamed x + y tiles, plus f32 y/h/t
    # intermediates the compiler keeps live inside the fused body.
    per_row = 2 * (c + mp) * dtype_bytes + 3 * mp * 4
    tb_max = max(sub, (avail // per_row) // sub * sub)
    # Aim for >= ~1.5 MiB streamed per grid step (step overhead ~0.35us).
    target = _round_up(max(sub, pl.cdiv(3 << 19, (c + mp) * dtype_bytes)), sub)
    tb = min(tb_max, target)
    b_sub = _round_up(batch, sub)
    if b_sub >= 2 * sub:
        # keep >= 2 grid steps so the "parallel" axis can span v7x's 2 TCs
        tb = min(tb, _round_up(pl.cdiv(b_sub, 2), sub))
    tb = max(min(tb, b_sub), sub)
    # Minimize batch padding without increasing the number of tiles.
    num_tiles = pl.cdiv(b_sub, tb)
    tb = _round_up(pl.cdiv(b_sub, num_tiles), sub)
    return tb


# --------------------------------------------------------------------------
# One-time weight preprocessing (hoisted out of the per-forward jit)
# --------------------------------------------------------------------------
def prepare_weights(fc1_weight, res_weights=()):
    """fc1_weight [M, C], res_weights tuple of ([M,M],[M,M]) ->
       (w1_t [C, Mp], tuple of (wa_t, wb_t) each [Mp, Mp]), zero padded."""
    M, _ = fc1_weight.shape
    Mp = _round_up(M, 128)
    pad = Mp - M
    w1_t = jnp.pad(fc1_weight.T, ((0, 0), (0, pad)))
    res = []
    for wa, wb in res_weights:
        res.append((jnp.pad(wa.T, ((0, pad), (0, pad))),
                    jnp.pad(wb.T, ((0, pad), (0, pad)))))
    return w1_t, tuple(res)


# --------------------------------------------------------------------------
# Forward pass (single fused pallas_call)
# --------------------------------------------------------------------------
@partial(jax.jit, static_argnames=("m_dim",))
def dim_reduction_fwd(x, w1_t, res_wts, *, m_dim):
    B, C = x.shape
    Cw, Mp = w1_t.shape
    assert C == Cw
    num_res = len(res_wts)

    dtype_bytes = jnp.dtype(x.dtype).itemsize
    budget = _vmem_budget_bytes()
    TB = _choose_batch_tile(B, C, Mp, dtype_bytes, num_res, budget)
    Bp = _round_up(B, TB)
    xp = jnp.pad(x, ((0, Bp - B), (0, 0))) if Bp != B else x

    flat_w = [w1_t]
    for wa_t, wb_t in res_wts:
        flat_w += [wa_t, wb_t]

    # Streamed x tile + VMEM-resident weights (constant index_map).
    in_specs = [pl.BlockSpec((TB, C), lambda i: (i, 0)),
                pl.BlockSpec((C, Mp), lambda i: (0, 0))]
    for _ in range(num_res):
        in_specs += [pl.BlockSpec((Mp, Mp), lambda i: (0, 0)),
                     pl.BlockSpec((Mp, Mp), lambda i: (0, 0))]

    y = pl.pallas_call(
        _make_fused_kernel(num_res),
        out_shape=jax.ShapeDtypeStruct((Bp, Mp), x.dtype),
        grid_spec=pltpu.PrefetchScalarGridSpec(
            num_scalar_prefetch=0,
            grid=(Bp // TB,),
            in_specs=in_specs,
            out_specs=pl.BlockSpec((TB, Mp), lambda i: (i, 0)),
        ),
        compiler_params=pltpu.CompilerParams(
            dimension_semantics=("parallel",),
            vmem_limit_bytes=int(budget),
        ),
    )(xp, *flat_w)

    # Slice away batch / lane padding (padded cols are exactly zero).
    return y[:B, :m_dim]


def dim_reduction(x, fc1_weight, res_weights=()):
    """Convenience wrapper: preprocess weights + run fused forward."""
    w1_t, res_wts = prepare_weights(fc1_weight, res_weights)
    return dim_reduction_fwd(x, w1_t, res_wts, m_dim=fc1_weight.shape[0])


# --------------------------------------------------------------------------
# Reference + test
# --------------------------------------------------------------------------
def _reference(x, w1, res_ws):
    y = jnp.maximum(x @ w1.T, 0.0)
    for wa, wb in res_ws:
        tt = jnp.maximum(jnp.maximum(y @ wa.T, 0.0) @ wb.T, 0.0)
        y = y + tt
    return y


if __name__ == "__main__":
    key = jax.random.PRNGKey(0)
    k1, k2, k3 = jax.random.split(key, 3)

    batch = 8
    n_channels = 32
    m_dim = 64            # exercises the 128-lane padding path
    num_layer_res = 1     # exercises the fused residual-block path

    x = jax.random.normal(k1, (batch, n_channels), dtype=jnp.float32)

    bound1 = 1.0 / (n_channels ** 0.5)
    w1 = jax.random.uniform(
        k2, (m_dim, n_channels), minval=-bound1, maxval=bound1, dtype=jnp.float32
    )

    bound2 = 1.0 / (m_dim ** 0.5)
    res_weights = []
    kk = k3
    for _ in range(num_layer_res):
        kk, ka, kb = jax.random.split(kk, 3)
        wa = jax.random.uniform(
            ka, (m_dim, m_dim), minval=-bound2, maxval=bound2, dtype=jnp.float32
        )
        wb = jax.random.uniform(
            kb, (m_dim, m_dim), minval=-bound2, maxval=bound2, dtype=jnp.float32
        )
        res_weights.append((wa, wb))
    res_weights = tuple(res_weights)

    # One-time weight preprocessing (hoisted out of the forward).
    w1_t, res_wts = prepare_weights(w1, res_weights)

    # With residual blocks.
    y = dim_reduction_fwd(x, w1_t, res_wts, m_dim=m_dim)
    jax.block_until_ready(y)
    y_ref = _reference(x, w1, res_weights)
    assert y.shape == (batch, m_dim)
    assert jnp.allclose(y, y_ref, atol=1e-5, rtol=1e-5)

    # numLayer_Res = 0 path (fc1 + ReLU only).
    y0 = dim_reduction_fwd(x, w1_t, (), m_dim=m_dim)
    jax.block_until_ready(y0)
    y0_ref = _reference(x, w1, ())
    assert jnp.allclose(y0, y0_ref, atol=1e-5, rtol=1e-5)

    print("KERNEL_OK")
</pallas_src>

<mosaic_0001>
module attributes {stable_mosaic.version = 11 : i64} {
  func.func @kernel(%arg0: i32, %arg1: memref<8x32xf32, #tpu.memory_space<vmem>>, %arg2: memref<32x128xf32, #tpu.memory_space<vmem>>, %arg3: memref<128x128xf32, #tpu.memory_space<vmem>>, %arg4: memref<128x128xf32, #tpu.memory_space<vmem>>, %arg5: memref<8x128xf32, #tpu.memory_space<vmem>>) attributes {dimension_semantics = [#tpu.dimension_semantics<parallel>], iteration_bounds = array<i64: 1>, scalar_prefetch = 0 : i64, scratch_operands = 0 : i64, tpu.core_type = #tpu.core_type<tc>, window_params = [{transform_indices = @transform_0, window_bounds = array<i64: 8, 32>}, {pipeline_mode = #tpu.pipeline_mode<synchronous>, transform_indices = @transform_1, window_bounds = array<i64: 32, 128>}, {pipeline_mode = #tpu.pipeline_mode<synchronous>, transform_indices = @transform_2, window_bounds = array<i64: 128, 128>}, {pipeline_mode = #tpu.pipeline_mode<synchronous>, transform_indices = @transform_3, window_bounds = array<i64: 128, 128>}, {transform_indices = @transform_4, window_bounds = array<i64: 8, 128>}]} {
    %c0 = arith.constant 0 : index
    %c0_0 = arith.constant 0 : index
    %0 = vector.load %arg1[%c0, %c0_0] : memref<8x32xf32, #tpu.memory_space<vmem>>, vector<8x32xf32>
    %c0_1 = arith.constant 0 : index
    %c0_2 = arith.constant 0 : index
    %1 = vector.load %arg2[%c0_1, %c0_2] : memref<32x128xf32, #tpu.memory_space<vmem>>, vector<32x128xf32>
    %cst = arith.constant dense<0.000000e+00> : vector<8x128xf32>
    %2 = tpu.matmul %0, %1, %cst {dimension_numbers = #tpu.dot_dimension_numbers<[1], [0], [0], [1], [0, 0, 1, 1], [], []>} : vector<8x32xf32>, vector<32x128xf32>, vector<8x128xf32> -> vector<8x128xf32>
    %cst_3 = arith.constant 0.000000e+00 : f32
    %3 = vector.broadcast %cst_3 : f32 to vector<8x128xf32>
    %4 = arith.maximumf %2, %3 : vector<8x128xf32>
    %c0_4 = arith.constant 0 : index
    %c0_5 = arith.constant 0 : index
    %5 = vector.load %arg3[%c0_4, %c0_5] : memref<128x128xf32, #tpu.memory_space<vmem>>, vector<128x128xf32>
    %c0_6 = arith.constant 0 : index
    %c0_7 = arith.constant 0 : index
    %6 = vector.load %arg4[%c0_6, %c0_7] : memref<128x128xf32, #tpu.memory_space<vmem>>, vector<128x128xf32>
    %cst_8 = arith.constant dense<0.000000e+00> : vector<8x128xf32>
    %7 = tpu.matmul %4, %5, %cst_8 {dimension_numbers = #tpu.dot_dimension_numbers<[1], [0], [0], [1], [0, 0, 1, 1], [], []>} : vector<8x128xf32>, vector<128x128xf32>, vector<8x128xf32> -> vector<8x128xf32>
    %cst_9 = arith.constant 0.000000e+00 : f32
    %8 = vector.broadcast %cst_9 : f32 to vector<8x128xf32>
    %9 = arith.maximumf %7, %8 : vector<8x128xf32>
    %cst_10 = arith.constant dense<0.000000e+00> : vector<8x128xf32>
    %10 = tpu.matmul %9, %6, %cst_10 {dimension_numbers = #tpu.dot_dimension_numbers<[1], [0], [0], [1], [0, 0, 1, 1], [], []>} : vector<8x128xf32>, vector<128x128xf32>, vector<8x128xf32> -> vector<8x128xf32>
    %cst_11 = arith.constant 0.000000e+00 : f32
    %11 = vector.broadcast %cst_11 : f32 to vector<8x128xf32>
    %12 = arith.maximumf %10, %11 : vector<8x128xf32>
    %13 = arith.addf %4, %12 : vector<8x128xf32>
    %c0_12 = arith.constant 0 : index
    %c0_13 = arith.constant 0 : index
    %14 = vector.load %arg5[%c0_12, %c0_13] : memref<8x128xf32, #tpu.memory_space<vmem>>, vector<8x128xf32>
    tpu.vector_store %arg5[%c0_12, %c0_13], %13 {strides = array<i32>} : memref<8x128xf32, #tpu.memory_space<vmem>>, vector<8x128xf32>,
    return
  }
  func.func @transform_0(%arg0: i32) -> (i32, i32) {
    %c0_i32 = arith.constant 0 : i32
    %c0_i32_0 = arith.constant 0 : i32
    return %arg0, %c0_i32 : i32, i32
  }
  func.func @transform_1(%arg0: i32) -> (i32, i32) {
    %c0_i32 = arith.constant 0 : i32
    %c0_i32_0 = arith.constant 0 : i32
    %c0_i32_1 = arith.constant 0 : i32
    return %c0_i32, %c0_i32_0 : i32, i32
  }
  func.func @transform_2(%arg0: i32) -> (i32, i32) {
    %c0_i32 = arith.constant 0 : i32
    %c0_i32_0 = arith.constant 0 : i32
    %c0_i32_1 = arith.constant 0 : i32
    return %c0_i32, %c0_i32_0 : i32, i32
  }
  func.func @transform_3(%arg0: i32) -> (i32, i32) {
    %c0_i32 = arith.constant 0 : i32
    %c0_i32_0 = arith.constant 0 : i32
    %c0_i32_1 = arith.constant 0 : i32
    return %c0_i32, %c0_i32_0 : i32, i32
  }
  func.func @transform_4(%arg0: i32) -> (i32, i32) {
    %c0_i32 = arith.constant 0 : i32
    %c0_i32_0 = arith.constant 0 : i32
    return %arg0, %c0_i32 : i32, i32
  }
}

</mosaic_0001>

<bundles_post_ra>
// kernel: dim_reduction_fwd.1
= control target key start
LH: loop header
LB: loop body
LE: loop exit
PB: predicated region body
PF: predicated region fallthrough
CT: control target
= control target key end

     0   :  { %9 = vsyncpa [#allocation3], 0  ;;  %s387_s0 = inlined_call_operand.hbm [shape: f32[8,32], index: 0, kind: input, shape index: {}]   ;;  %s388_s1 = inlined_call_operand.hbm [shape: f32[32,128], index: 1, kind: input, shape index: {}]   ;;  %s389_s2 = inlined_call_operand.hbm [shape: f32[128,128], index: 2, kind: input, shape index: {}]   ;;  %s390_s3 = inlined_call_operand.hbm [shape: f32[128,128], index: 3, kind: input, shape index: {}]   ;;  %s391_s4 = inlined_call_operand.hbm [shape: f32[8,128], index: 4, kind: output, shape index: {}]  }
   0x1   :  { %10 = vsyncpa [#allocation6], 0 }
   0x2   :  { %11 = vsyncpa [#allocation9], 0  ;;  %s28_s17 = sshll.u32 %s388_s1, 4  ;;  %s29_s17 = int_to_ptr.hbm [resolvable:$true] %s28_s17 }
   0x3   :  { %12 = vsyncpa [#allocation4], 0  ;;  %s340_s18 = smov [#allocation5]   ;;  %s18_s22 = sshll.u32 %s387_s0, 4  ;;  %s19_s22 = int_to_ptr.hbm [resolvable:$true] %s18_s22 }
   0x4   :  { %s30_s19 = sshll.u32 %s340_s18, 4  ;;  %s341_s23 = smov 128   ;;  %s31_s19 = int_to_ptr.vmem [resolvable:$true] %s30_s19 }
   0x5   :  { %s342_s24 = smov 8   ;;  %s343_s25 = smov [#allocation2]  }
   0x6   :  { %36 = dma.hbm_to_vmem [thread:$0]  %s29_s17, 512, %s31_s19, [#allocation6], %s341_s23, %s341_s23, %s342_s24  }
   0x7   :  { %s20_s26 = sshll.u32 %s343_s25, 4  ;;  %s41_s29 = sshll.u32 %s389_s2, 4  ;;  %s21_s26 = int_to_ptr.vmem [resolvable:$true] %s20_s26  ;;  %s42_s29 = int_to_ptr.hbm [resolvable:$true] %s41_s29 }
   0x8   :  { %23 = dma.hbm_to_vmem [thread:$0]  %s19_s22, 128, %s21_s26, [#allocation3]  }
   0x9   :  { %s54_s5 = sshll.u32 %s390_s3, 4  ;;  %s344_s6 = smov [#allocation7]   ;;  %s55_s5 = int_to_ptr.hbm [resolvable:$true] %s54_s5 }
   0xa   :  { %s43_s7 = sshll.u32 %s344_s6, 4  ;;  %s345_s0 = smov [#allocation8]   ;;  %s44_s7 = int_to_ptr.vmem [resolvable:$true] %s43_s7 }
   0xb   :  { %49 = dma.hbm_to_vmem [thread:$0]  %s42_s29, 2048, %s44_s7, [#allocation6], %s341_s23, %s341_s23, %s342_s24  }
   0xc   :  { %s56_s8 = sshll.u32 %s345_s0, 4  ;;  %s57_s8 = int_to_ptr.vmem [resolvable:$true] %s56_s8 }
   0xd   :  { %62 = dma.hbm_to_vmem [thread:$0]  %s55_s5, 2048, %s57_s8, [#allocation9], %s341_s23, %s341_s23, %s342_s24  }
   0xe   :  { %332 = dma.done.wait [#allocation3], 128  }
   0xf   :  { %333 = vsyncadd [#allocation3], 4294967168 }
  0x10   :  { %334 = dma.done.wait [#allocation6], 2560  }
  0x11   :  { %335 = vsyncadd [#allocation6], 4294964736 }
  0x12   :  { %336 = dma.done.wait [#allocation9], 2048  }
  0x13   :  { %337 = vsyncadd [#allocation9], 4294965248  ;;  %v83_v0 = vld [vmem:[#allocation5 + $0x18] sm:$0xff]  ;;  %v82_v1 = vld [vmem:[#allocation5 + $0x10] sm:$0xff]  ;;  %vm84_vm0 = vcmask 261120   ;;  %s346_s2 = smov [#allocation10]  }
  0x14   :  { %100 = vmatpush.msra.mxu0 %v83_v0  ;;  %v124_v2 = vld [vmem:[#allocation7 + $0x78] sm:$0xff]  ;;  %v81_v3 = vld [vmem:[#allocation5 + $0x8] sm:$0xff]  ;;  %v123_v4 = vld [vmem:[#allocation7 + $0x70] sm:$0xff]  ;;  %s190_s3 = sshll.u32 %s346_s2, 4  ;;  %s192_s11 = sshll.u32 %s391_s4, 4  ;;  %s191_s3 = int_to_ptr.vmem [resolvable:$true] %s190_s3  ;;  %s193_s11 = int_to_ptr.hbm [resolvable:$true] %s192_s11 }
  0x15   :  { %141 = vmatpush.msra.mxu1 %v124_v2  ;;  %v122_v5 = vld [vmem:[#allocation7 + $0x68] sm:$0xff]  ;;  %v80_v6 = vld [vmem:[#allocation5] sm:$0xff]  ;;  %v79_v7 = vld [vmem:[#allocation2] sm:$0xff] }
  0x16   :  { %101 = vmatpush.msra.mxu0 %v82_v1  ;;  %v121_v8 = vld [vmem:[#allocation7 + $0x60] sm:$0xff]  ;;  %v120_v9 = vld [vmem:[#allocation7 + $0x58] sm:$0xff]  ;;  %v119_v10 = vld [vmem:[#allocation7 + $0x50] sm:$0xff] }
  0x17   :  { %142 = vmatpush.msra.mxu1 %v123_v4  ;;  %v118_v11 = vld [vmem:[#allocation7 + $0x48] sm:$0xff]  ;;  %v117_v12 = vld [vmem:[#allocation7 + $0x40] sm:$0xff]  ;;  %v116_v13 = vld [vmem:[#allocation7 + $0x38] sm:$0xff] }
  0x18   :  { %102 = vmatpush.msra.mxu0 %v81_v3  ;;  %v115_v14 = vld [vmem:[#allocation7 + $0x30] sm:$0xff]  ;;  %v114_v15 = vld [vmem:[#allocation7 + $0x28] sm:$0xff]  ;;  %v113_v16 = vld [vmem:[#allocation7 + $0x20] sm:$0xff] }
  0x19   :  { %143 = vmatpush.msra.mxu1 %v122_v5  ;;  %v112_v17 = vld [vmem:[#allocation7 + $0x18] sm:$0xff]  ;;  %v111_v18 = vld [vmem:[#allocation7 + $0x10] sm:$0xff]  ;;  %v110_v19 = vld [vmem:[#allocation7 + $0x8] sm:$0xff] }
  0x1a   :  { %103 = vmatpush.msra.mxu0 %v80_v6  ;;  %v109_v20 = vld [vmem:[#allocation7] sm:$0xff]  ;;  %v140_v21 = vld [vmem:[#allocation8 + $0x78] sm:$0xff]  ;;  %v139_v22 = vld [vmem:[#allocation8 + $0x70] sm:$0xff] }
  0x1b   :  { %204 = vmatmul.msk.f32.vlgmr.msra.gmra.mxu0 %vm84_vm0, %v79_v7  ;;  %144 = vmatpush.msra.mxu1 %v121_v8  ;;  %v138_v23 = vld [vmem:[#allocation8 + $0x68] sm:$0xff]  ;;  %v137_v24 = vld [vmem:[#allocation8 + $0x60] sm:$0xff]  ;;  %v136_v25 = vld [vmem:[#allocation8 + $0x58] sm:$0xff] }
  0x1c   :  { %162 = vmatpush.msra.mxu2 %v140_v21  ;;  %v135_v26 = vld [vmem:[#allocation8 + $0x50] sm:$0xff]  ;;  %v134_v27 = vld [vmem:[#allocation8 + $0x48] sm:$0xff]  ;;  %v133_v28 = vld [vmem:[#allocation8 + $0x40] sm:$0xff] }
  0x1d   :  { %145 = vmatpush.msra.mxu1 %v120_v9  ;;  %v132_v29 = vld [vmem:[#allocation8 + $0x38] sm:$0xff]  ;;  %v131_v30 = vld [vmem:[#allocation8 + $0x30] sm:$0xff]  ;;  %v130_v31 = vld [vmem:[#allocation8 + $0x28] sm:$0xff] }
  0x1e   :  { %163 = vmatpush.msra.mxu2 %v139_v22  ;;  %v129_v32 = vld [vmem:[#allocation8 + $0x20] sm:$0xff]  ;;  %v128_v33 = vld [vmem:[#allocation8 + $0x18] sm:$0xff]  ;;  %v127_v34 = vld [vmem:[#allocation8 + $0x10] sm:$0xff] }
  0x1f   :  { %146 = vmatpush.msra.mxu1 %v119_v10  ;;  %v126_v37 = vld [vmem:[#allocation8 + $0x8] sm:$0xff]  ;;  %v125_v38 = vld [vmem:[#allocation8] sm:$0xff] }
  0x20   :  { %164 = vmatpush.msra.mxu2 %v138_v23 }
  0x21   :  { %147 = vmatpush.msra.mxu1 %v118_v11 }
  0x22   :  { %165 = vmatpush.msra.mxu2 %v137_v24 }
  0x23   :  { %148 = vmatpush.msra.mxu1 %v117_v12 }
  0x24   :  { %166 = vmatpush.msra.mxu2 %v136_v25 }
  0x25   :  { %149 = vmatpush.msra.mxu1 %v116_v13 }
  0x26   :  { %167 = vmatpush.msra.mxu2 %v135_v26 }
  0x27   :  { %150 = vmatpush.msra.mxu1 %v115_v14 }
  0x28   :  { %168 = vmatpush.msra.mxu2 %v134_v27 }
  0x29   :  { %151 = vmatpush.msra.mxu1 %v114_v15 }
  0x2a   :  { %169 = vmatpush.msra.mxu2 %v133_v28 }
  0x2b   :  { %152 = vmatpush.msra.mxu1 %v113_v16 }
  0x2c   :  { %170 = vmatpush.msra.mxu2 %v132_v29 }
  0x2d   :  { %153 = vmatpush.msra.mxu1 %v112_v17 }
  0x2e   :  { %171 = vmatpush.msra.mxu2 %v131_v30 }
  0x2f   :  { %154 = vmatpush.msra.mxu1 %v111_v18 }
  0x30   :  { %172 = vmatpush.msra.mxu2 %v130_v31 }
  0x31   :  { %155 = vmatpush.msra.mxu1 %v110_v19 }
  0x32   :  { %173 = vmatpush.msra.mxu2 %v129_v32 }
  0x33   :  { %156 = vmatpush.msra.mxu1 %v109_v20 }
  0x34   :  { %174 = vmatpush.msra.mxu2 %v128_v33 }
  0x36   :  { %175 = vmatpush.msra.mxu2 %v127_v34 }
  0x38   :  { %176 = vmatpush.msra.mxu2 %v126_v37 }
  0x3a   :  { %177 = vmatpush.msra.mxu2 %v125_v38 }
  0x98   :  { %v105_v35 = vpop.f32.mrf.mxu0 }
  0x99   :  { %v108_v36 = vmax.f32 %v105_v35, 0.0 }
  0x9b   :  { %157 = vmatmul.f32.vlgmr.msra.gmra.mxu1 %v108_v36 }
 0x118   :  { %v158_v39 = vpop.f32.mrf.mxu1 }
 0x119   :  { %v161_v40 = vmax.f32 %v158_v39, 0.0 }
 0x11b   :  { %178 = vmatmul.f32.vlgmr.msra.gmra.mxu2 %v161_v40 }
 0x19e   :  { %v179_v41 = vpop.f32.mrf.mxu2 }
 0x19f   :  { %v182_v42 = vmax.f32 %v179_v41, 0.0 }
 0x1a1   :  { %v183_v43 = vadd.f32 %v182_v42, %v108_v36 }
 0x1a3   :  { %184 = vst [vmem:[#allocation10] sm:$0xff] %v183_v43 }
 0x1a4   :  { %195 = dma.vmem_to_hbm [thread:$0]  %s191_s3, 128, %s193_s11, [#allocation4]  }
 0x1a5   :  { %338 = dma.done.wait [#allocation4], 128  }
 0x1a6   :  { %339 = vsyncadd [#allocation4], 4294967168 }
 0x1a7   :  { %200 = vsyncpa [#allocation3], 1 }
 0x1a8   :  { %201 = vsyncpa [#allocation6], 1 }
 0x1a9   :  { %202 = vsyncpa [#allocation9], 1 }
 0x1aa   :  { %203 = vsyncpa [#allocation4], 1 }

</bundles_post_ra>
